<compile_context>
chip_gen: v7x
topology: tpu7x:2x2x1
jax: 0.10.0
libtpu: 0.0.40
codegen_flags: <defaults>
</compile_context>

<pallas_src>
import functools

import jax
import jax.numpy as jnp
from jax import lax
from jax.experimental import pallas as pl
from jax.experimental.pallas import tpu as pltpu


# ---------------------------------------------------------------------------
# Pallas kernel: direct (no-im2col) conv taps + BN(eval) + LeakyReLU epilogue.
# ---------------------------------------------------------------------------
def _conv_bn_lrelu_kernel(x_ref, w_ref, scale_ref, shift_ref, o_ref, *,
                          rows, kh_taps, kw_taps, stride, dilation, wo,
                          neg_slope):
    """One (batch image, output-row tile) grid step.

    x_ref     : (Hp, C_in, Wp)        bf16  whole padded image, VMEM-resident
    w_ref     : (KH*KW, C_out, C_in)  bf16  per-tap weight matrices (unscaled)
    scale_ref : (C_out, 1)            f32   gamma / sqrt(var + eps)
    shift_ref : (C_out, 1)            f32   beta - mean * scale
    o_ref     : (rows, C_out, Wo)     bf16  output rows of this tile
    """
    t = pl.program_id(1)
    oh0 = t * rows
    c_out = o_ref.shape[1]

    scale = scale_ref[...]
    shift = shift_ref[...]
    # Hoist the tiny per-tap weight loads out of the row loop.
    w_taps = [w_ref[i] for i in range(kh_taps * kw_taps)]

    def row_body(r, carry):
        row0 = (oh0 + r) * stride
        acc = jnp.zeros((c_out, wo), jnp.float32)
        for kh in range(kh_taps):
            xrow = x_ref[row0 + kh * dilation]            # (C_in, Wp) bf16
            for kw in range(kw_taps):
                c0 = kw * dilation
                if stride == 1:
                    xs = xrow[:, c0:c0 + wo]              # static lane slice
                else:
                    # TODO(synk): stride>1 uses a lane-strided value slice; correct
                    # math but not exercised by this test.
                    xs = xrow[:, c0:c0 + (wo - 1) * stride + 1:stride]
                acc = acc + jnp.dot(w_taps[kh * kw_taps + kw], xs,
                                    preferred_element_type=jnp.float32)
        y = acc * scale + shift                           # BN (eval) in f32
        o_ref[r] = jnp.where(y >= 0.0, y, neg_slope * y).astype(o_ref.dtype)
        return carry

    lax.fori_loop(0, rows, row_body, 0, unroll=rows <= 8)


# ---------------------------------------------------------------------------
# BasicConv2d forward (wrapper: layout prep only; all compute in the kernel).
# ---------------------------------------------------------------------------
def basic_conv2d(x_nchw, weight, bn_gamma, bn_beta, bn_mean, bn_var,
                 *, stride=1, padding=0, dilation=1, eps=1e-5):
    N, C_in, H, W = x_nchw.shape
    C_out, _, KH, KW = weight.shape

    H_out = (H + 2 * padding - dilation * (KH - 1) - 1) // stride + 1
    W_out = (W + 2 * padding - dilation * (KW - 1) - 1) // stride + 1
    Hp, Wp = H + 2 * padding, W + 2 * padding

    # NCHW -> (N, H, C_in, W): every padded image row is already a (C_in, W)
    # MXU operand. bf16 halves HBM/VMEM traffic. Only input-sized pads remain.
    xt = jnp.transpose(x_nchw, (0, 2, 1, 3)).astype(jnp.bfloat16)
    xt = jnp.pad(xt, ((0, 0), (padding, padding), (0, 0), (padding, padding)))

    # BatchNorm (eval mode, running statistics) folded to scale/shift and
    # applied in the f32 epilogue (weights stay unscaled bf16 for precision).
    # TODO(synk): training-mode BatchNorm (batch statistics) is not implemented.
    scale = (bn_gamma.astype(jnp.float32)
             / jnp.sqrt(bn_var.astype(jnp.float32) + eps)).reshape(C_out, 1)
    shift = (bn_beta.astype(jnp.float32).reshape(C_out, 1)
             - bn_mean.astype(jnp.float32).reshape(C_out, 1) * scale)

    # (C_out, C_in, KH, KW) -> (KH*KW, C_out, C_in) per-tap matrices, bf16.
    w_taps = jnp.transpose(weight, (2, 3, 0, 1)).reshape(KH * KW, C_out, C_in)
    w_taps = w_taps.astype(jnp.bfloat16)

    # Output rows per grid step: must divide H_out and be a multiple of 8
    # (sublane granule) or equal H_out; grow the tile while the parallel grid
    # extent stays >= 2 so v7x's two TensorCores both get work.
    rows = H_out
    if H_out % 8 == 0:
        rows = 8
        while (rows * 2 <= min(H_out, 64) and H_out % (rows * 2) == 0
               and N * (H_out // (rows * 2)) >= 2):
            rows *= 2
    grid = (N, H_out // rows)

    kernel = functools.partial(
        _conv_bn_lrelu_kernel, rows=rows, kh_taps=KH, kw_taps=KW,
        stride=stride, dilation=dilation, wo=W_out, neg_slope=0.01)

    cost = pl.CostEstimate(
        flops=2 * N * C_out * H_out * W_out * C_in * KH * KW,
        transcendentals=0,
        bytes_accessed=(N * Hp * C_in * Wp * 2
                        + KH * KW * C_out * C_in * 2
                        + 2 * C_out * 4
                        + N * H_out * C_out * W_out * 2),
    )

    # TODO(synk): for very large images the whole padded image per grid step may
    # exceed VMEM; add an H-halo row-tiled input BlockSpec for that regime.
    out = pl.pallas_call(
        kernel,
        out_shape=jax.ShapeDtypeStruct((N, H_out, C_out, W_out), jnp.bfloat16),
        grid_spec=pltpu.PrefetchScalarGridSpec(
            num_scalar_prefetch=0,
            grid=grid,
            in_specs=[
                # Whole padded image; constant over the row-tile axis, so it is
                # DMA'd from HBM exactly once per image and stays VMEM-resident.
                pl.BlockSpec((None, Hp, C_in, Wp), lambda n, t: (n, 0, 0, 0)),
                pl.BlockSpec((KH * KW, C_out, C_in), lambda n, t: (0, 0, 0)),
                pl.BlockSpec((C_out, 1), lambda n, t: (0, 0)),
                pl.BlockSpec((C_out, 1), lambda n, t: (0, 0)),
            ],
            out_specs=pl.BlockSpec((None, rows, C_out, W_out),
                                   lambda n, t: (n, t, 0, 0)),
        ),
        compiler_params=pltpu.CompilerParams(
            dimension_semantics=("parallel", "parallel"),
            vmem_limit_bytes=32 * 1024 * 1024),
        cost_estimate=cost,
    )(xt, w_taps, scale, shift)

    # (N, Ho, C_out, Wo) -> NCHW for PyTorch parity; the transpose runs on the
    # bf16 output (output-sized, cheap). Output stays bf16; cast downstream if
    # strict f32 parity is needed.
    return jnp.transpose(out, (0, 2, 1, 3))


# ---------------------------------------------------------------------------
# Pure-JAX f32 reference for the correctness check.
# ---------------------------------------------------------------------------
def basic_conv2d_ref(x, weight, g, b, m, v, *, stride, padding, dilation,
                     eps=1e-5):
    y = jax.lax.conv_general_dilated(
        x.astype(jnp.float32), weight.astype(jnp.float32),
        window_strides=(stride, stride),
        padding=((padding, padding), (padding, padding)),
        rhs_dilation=(dilation, dilation),
        dimension_numbers=("NCHW", "OIHW", "NCHW"))
    scale = g / jnp.sqrt(v + eps)
    y = y * scale[None, :, None, None] + (b - m * scale)[None, :, None, None]
    return jnp.where(y >= 0, y, 0.01 * y)


if __name__ == "__main__":
    # BasicConv2d(in_planes=4, out_planes=8, kernel_size=3, stride=1, padding=1)
    N, C_in, H, W = 2, 4, 16, 16
    C_out, KH, KW = 8, 3, 3
    stride, padding, dilation = 1, 1, 1

    key = jax.random.PRNGKey(0)
    kx, kw_, kg, kb, km, kv = jax.random.split(key, 6)

    x = jax.random.normal(kx, (N, C_in, H, W), dtype=jnp.float32)
    weight = jax.random.normal(kw_, (C_out, C_in, KH, KW), dtype=jnp.float32) * 0.1
    bn_gamma = 1.0 + 0.1 * jax.random.normal(kg, (C_out,), dtype=jnp.float32)
    bn_beta = 0.1 * jax.random.normal(kb, (C_out,), dtype=jnp.float32)
    bn_mean = 0.05 * jax.random.normal(km, (C_out,), dtype=jnp.float32)
    bn_var = jnp.abs(1.0 + 0.1 * jax.random.normal(kv, (C_out,), dtype=jnp.float32))

    fwd = functools.partial(basic_conv2d, stride=stride, padding=padding,
                            dilation=dilation)
    out = jax.jit(fwd)(x, weight, bn_gamma, bn_beta, bn_mean, bn_var)
    out = jax.block_until_ready(out)

    ref = basic_conv2d_ref(x, weight, bn_gamma, bn_beta, bn_mean, bn_var,
                           stride=stride, padding=padding, dilation=dilation)
    assert out.shape == (N, C_out, H, W)
    # bf16 MXU inputs + bf16 output (f32 accumulate/epilogue) -> loose tolerance
    # vs. the f32 reference.
    assert jnp.allclose(out.astype(jnp.float32), ref, atol=5e-2, rtol=5e-2), \
        "mismatch vs reference"

    print("KERNEL_OK")
</pallas_src>

<mosaic_0001>
module attributes {stable_mosaic.version = 11 : i64} {
  func.func @_conv_bn_lrelu_kernel(%arg0: i32, %arg1: i32, %arg2: memref<1x18x4x18xbf16, #tpu.memory_space<vmem>>, %arg3: memref<9x8x4xbf16, #tpu.memory_space<vmem>>, %arg4: memref<8x1xf32, #tpu.memory_space<vmem>>, %arg5: memref<8x1xf32, #tpu.memory_space<vmem>>, %arg6: memref<1x16x8x16xbf16, #tpu.memory_space<vmem>>) attributes {dimension_semantics = [#tpu.dimension_semantics<parallel>, #tpu.dimension_semantics<parallel>], iteration_bounds = array<i64: 2, 1>, scalar_prefetch = 0 : i64, scratch_operands = 0 : i64, tpu.core_type = #tpu.core_type<tc>, window_params = [{transform_indices = @transform_0, window_bounds = array<i64: 1, 18, 4, 18>}, {pipeline_mode = #tpu.pipeline_mode<synchronous>, transform_indices = @transform_1, window_bounds = array<i64: 9, 8, 4>}, {pipeline_mode = #tpu.pipeline_mode<synchronous>, transform_indices = @transform_2, window_bounds = array<i64: 8, 1>}, {pipeline_mode = #tpu.pipeline_mode<synchronous>, transform_indices = @transform_3, window_bounds = array<i64: 8, 1>}, {transform_indices = @transform_4, window_bounds = array<i64: 1, 16, 8, 16>}]} {
    %c16_i32 = arith.constant 16 : i32
    %0 = arith.muli %arg1, %c16_i32 : i32
    %c0 = arith.constant 0 : index
    %c0_0 = arith.constant 0 : index
    %1 = vector.load %arg4[%c0, %c0_0] : memref<8x1xf32, #tpu.memory_space<vmem>>, vector<8x1xf32>
    %c0_1 = arith.constant 0 : index
    %c0_2 = arith.constant 0 : index
    %2 = vector.load %arg5[%c0_1, %c0_2] : memref<8x1xf32, #tpu.memory_space<vmem>>, vector<8x1xf32>
    %c0_3 = arith.constant 0 : index
    %c0_4 = arith.constant 0 : index
    %c0_5 = arith.constant 0 : index
    %3 = vector.load %arg3[%c0_3, %c0_4, %c0_5] : memref<9x8x4xbf16, #tpu.memory_space<vmem>>, vector<1x8x4xbf16>
    %4 = vector.shape_cast %3 : vector<1x8x4xbf16> to vector<8x4xbf16>
    %c1 = arith.constant 1 : index
    %c0_6 = arith.constant 0 : index
    %c0_7 = arith.constant 0 : index
    %5 = vector.load %arg3[%c1, %c0_6, %c0_7] : memref<9x8x4xbf16, #tpu.memory_space<vmem>>, vector<1x8x4xbf16>
    %6 = vector.shape_cast %5 : vector<1x8x4xbf16> to vector<8x4xbf16>
    %c2 = arith.constant 2 : index
    %c0_8 = arith.constant 0 : index
    %c0_9 = arith.constant 0 : index
    %7 = vector.load %arg3[%c2, %c0_8, %c0_9] : memref<9x8x4xbf16, #tpu.memory_space<vmem>>, vector<1x8x4xbf16>
    %8 = vector.shape_cast %7 : vector<1x8x4xbf16> to vector<8x4xbf16>
    %c3 = arith.constant 3 : index
    %c0_10 = arith.constant 0 : index
    %c0_11 = arith.constant 0 : index
    %9 = vector.load %arg3[%c3, %c0_10, %c0_11] : memref<9x8x4xbf16, #tpu.memory_space<vmem>>, vector<1x8x4xbf16>
    %10 = vector.shape_cast %9 : vector<1x8x4xbf16> to vector<8x4xbf16>
    %c4 = arith.constant 4 : index
    %c0_12 = arith.constant 0 : index
    %c0_13 = arith.constant 0 : index
    %11 = vector.load %arg3[%c4, %c0_12, %c0_13] : memref<9x8x4xbf16, #tpu.memory_space<vmem>>, vector<1x8x4xbf16>
    %12 = vector.shape_cast %11 : vector<1x8x4xbf16> to vector<8x4xbf16>
    %c5 = arith.constant 5 : index
    %c0_14 = arith.constant 0 : index
    %c0_15 = arith.constant 0 : index
    %13 = vector.load %arg3[%c5, %c0_14, %c0_15] : memref<9x8x4xbf16, #tpu.memory_space<vmem>>, vector<1x8x4xbf16>
    %14 = vector.shape_cast %13 : vector<1x8x4xbf16> to vector<8x4xbf16>
    %c6 = arith.constant 6 : index
    %c0_16 = arith.constant 0 : index
    %c0_17 = arith.constant 0 : index
    %15 = vector.load %arg3[%c6, %c0_16, %c0_17] : memref<9x8x4xbf16, #tpu.memory_space<vmem>>, vector<1x8x4xbf16>
    %16 = vector.shape_cast %15 : vector<1x8x4xbf16> to vector<8x4xbf16>
    %c7 = arith.constant 7 : index
    %c0_18 = arith.constant 0 : index
    %c0_19 = arith.constant 0 : index
    %17 = vector.load %arg3[%c7, %c0_18, %c0_19] : memref<9x8x4xbf16, #tpu.memory_space<vmem>>, vector<1x8x4xbf16>
    %18 = vector.shape_cast %17 : vector<1x8x4xbf16> to vector<8x4xbf16>
    %c8 = arith.constant 8 : index
    %c0_20 = arith.constant 0 : index
    %c0_21 = arith.constant 0 : index
    %19 = vector.load %arg3[%c8, %c0_20, %c0_21] : memref<9x8x4xbf16, #tpu.memory_space<vmem>>, vector<1x8x4xbf16>
    %20 = vector.shape_cast %19 : vector<1x8x4xbf16> to vector<8x4xbf16>
    %c0_i32 = arith.constant 0 : i32
    %c16_i32_22 = arith.constant 16 : i32
    %21 = arith.addi %c0_i32, %c16_i32_22 : i32
    %c1_i32 = arith.constant 1 : i32
    scf.for %arg7 = %c0_i32 to %21 step %c1_i32  : i32 {
      %22 = arith.addi %0, %arg7 : i32
      %c1_i32_24 = arith.constant 1 : i32
      %23 = arith.muli %22, %c1_i32_24 : i32
      %cst = arith.constant 0.000000e+00 : f32
      %24 = vector.broadcast %cst : f32 to vector<8x16xf32>
      %c0_i32_25 = arith.constant 0 : i32
      %25 = arith.addi %23, %c0_i32_25 : i32
      %c0_26 = arith.constant 0 : index
      %26 = arith.index_cast %25 : i32 to index
      %c0_27 = arith.constant 0 : index
      %c0_28 = arith.constant 0 : index
      %27 = vector.load %arg2[%c0_26, %26, %c0_27, %c0_28] : memref<1x18x4x18xbf16, #tpu.memory_space<vmem>>, vector<1x1x4x18xbf16>
      %28 = vector.shape_cast %27 : vector<1x1x4x18xbf16> to vector<4x18xbf16>
      %29 = vector.extract_strided_slice %28 {offsets = [0, 0], sizes = [4, 16], strides = [1, 1]} : vector<4x18xbf16> to vector<4x16xbf16>
      %cst_29 = arith.constant dense<0.000000e+00> : vector<8x16xf32>
      %30 = tpu.matmul %4, %29, %cst_29 {dimension_numbers = #tpu.dot_dimension_numbers<[1], [0], [0], [1], [0, 0, 1, 1], [], []>} : vector<8x4xbf16>, vector<4x16xbf16>, vector<8x16xf32> -> vector<8x16xf32>
      %31 = arith.addf %24, %30 : vector<8x16xf32>
      %32 = vector.extract_strided_slice %28 {offsets = [0, 1], sizes = [4, 16], strides = [1, 1]} : vector<4x18xbf16> to vector<4x16xbf16>
      %cst_30 = arith.constant dense<0.000000e+00> : vector<8x16xf32>
      %33 = tpu.matmul %6, %32, %cst_30 {dimension_numbers = #tpu.dot_dimension_numbers<[1], [0], [0], [1], [0, 0, 1, 1], [], []>} : vector<8x4xbf16>, vector<4x16xbf16>, vector<8x16xf32> -> vector<8x16xf32>
      %34 = arith.addf %31, %33 : vector<8x16xf32>
      %35 = vector.extract_strided_slice %28 {offsets = [0, 2], sizes = [4, 16], strides = [1, 1]} : vector<4x18xbf16> to vector<4x16xbf16>
      %cst_31 = arith.constant dense<0.000000e+00> : vector<8x16xf32>
      %36 = tpu.matmul %8, %35, %cst_31 {dimension_numbers = #tpu.dot_dimension_numbers<[1], [0], [0], [1], [0, 0, 1, 1], [], []>} : vector<8x4xbf16>, vector<4x16xbf16>, vector<8x16xf32> -> vector<8x16xf32>
      %37 = arith.addf %34, %36 : vector<8x16xf32>
      %c1_i32_32 = arith.constant 1 : i32
      %38 = arith.addi %23, %c1_i32_32 : i32
      %c0_33 = arith.constant 0 : index
      %39 = arith.index_cast %38 : i32 to index
      %c0_34 = arith.constant 0 : index
      %c0_35 = arith.constant 0 : index
      %40 = vector.load %arg2[%c0_33, %39, %c0_34, %c0_35] : memref<1x18x4x18xbf16, #tpu.memory_space<vmem>>, vector<1x1x4x18xbf16>
      %41 = vector.shape_cast %40 : vector<1x1x4x18xbf16> to vector<4x18xbf16>
      %42 = vector.extract_strided_slice %41 {offsets = [0, 0], sizes = [4, 16], strides = [1, 1]} : vector<4x18xbf16> to vector<4x16xbf16>
      %cst_36 = arith.constant dense<0.000000e+00> : vector<8x16xf32>
      %43 = tpu.matmul %10, %42, %cst_36 {dimension_numbers = #tpu.dot_dimension_numbers<[1], [0], [0], [1], [0, 0, 1, 1], [], []>} : vector<8x4xbf16>, vector<4x16xbf16>, vector<8x16xf32> -> vector<8x16xf32>
      %44 = arith.addf %37, %43 : vector<8x16xf32>
      %45 = vector.extract_strided_slice %41 {offsets = [0, 1], sizes = [4, 16], strides = [1, 1]} : vector<4x18xbf16> to vector<4x16xbf16>
      %cst_37 = arith.constant dense<0.000000e+00> : vector<8x16xf32>
      %46 = tpu.matmul %12, %45, %cst_37 {dimension_numbers = #tpu.dot_dimension_numbers<[1], [0], [0], [1], [0, 0, 1, 1], [], []>} : vector<8x4xbf16>, vector<4x16xbf16>, vector<8x16xf32> -> vector<8x16xf32>
      %47 = arith.addf %44, %46 : vector<8x16xf32>
      %48 = vector.extract_strided_slice %41 {offsets = [0, 2], sizes = [4, 16], strides = [1, 1]} : vector<4x18xbf16> to vector<4x16xbf16>
      %cst_38 = arith.constant dense<0.000000e+00> : vector<8x16xf32>
      %49 = tpu.matmul %14, %48, %cst_38 {dimension_numbers = #tpu.dot_dimension_numbers<[1], [0], [0], [1], [0, 0, 1, 1], [], []>} : vector<8x4xbf16>, vector<4x16xbf16>, vector<8x16xf32> -> vector<8x16xf32>
      %50 = arith.addf %47, %49 : vector<8x16xf32>
      %c2_i32 = arith.constant 2 : i32
      %51 = arith.addi %23, %c2_i32 : i32
      %c0_39 = arith.constant 0 : index
      %52 = arith.index_cast %51 : i32 to index
      %c0_40 = arith.constant 0 : index
      %c0_41 = arith.constant 0 : index
      %53 = vector.load %arg2[%c0_39, %52, %c0_40, %c0_41] : memref<1x18x4x18xbf16, #tpu.memory_space<vmem>>, vector<1x1x4x18xbf16>
      %54 = vector.shape_cast %53 : vector<1x1x4x18xbf16> to vector<4x18xbf16>
      %55 = vector.extract_strided_slice %54 {offsets = [0, 0], sizes = [4, 16], strides = [1, 1]} : vector<4x18xbf16> to vector<4x16xbf16>
      %cst_42 = arith.constant dense<0.000000e+00> : vector<8x16xf32>
      %56 = tpu.matmul %16, %55, %cst_42 {dimension_numbers = #tpu.dot_dimension_numbers<[1], [0], [0], [1], [0, 0, 1, 1], [], []>} : vector<8x4xbf16>, vector<4x16xbf16>, vector<8x16xf32> -> vector<8x16xf32>
      %57 = arith.addf %50, %56 : vector<8x16xf32>
      %58 = vector.extract_strided_slice %54 {offsets = [0, 1], sizes = [4, 16], strides = [1, 1]} : vector<4x18xbf16> to vector<4x16xbf16>
      %cst_43 = arith.constant dense<0.000000e+00> : vector<8x16xf32>
      %59 = tpu.matmul %18, %58, %cst_43 {dimension_numbers = #tpu.dot_dimension_numbers<[1], [0], [0], [1], [0, 0, 1, 1], [], []>} : vector<8x4xbf16>, vector<4x16xbf16>, vector<8x16xf32> -> vector<8x16xf32>
      %60 = arith.addf %57, %59 : vector<8x16xf32>
      %61 = vector.extract_strided_slice %54 {offsets = [0, 2], sizes = [4, 16], strides = [1, 1]} : vector<4x18xbf16> to vector<4x16xbf16>
      %cst_44 = arith.constant dense<0.000000e+00> : vector<8x16xf32>
      %62 = tpu.matmul %20, %61, %cst_44 {dimension_numbers = #tpu.dot_dimension_numbers<[1], [0], [0], [1], [0, 0, 1, 1], [], []>} : vector<8x4xbf16>, vector<4x16xbf16>, vector<8x16xf32> -> vector<8x16xf32>
      %63 = arith.addf %60, %62 : vector<8x16xf32>
      %64 = vector.broadcast %1 : vector<8x1xf32> to vector<8x16xf32>
      %65 = arith.mulf %63, %64 : vector<8x16xf32>
      %66 = vector.broadcast %2 : vector<8x1xf32> to vector<8x16xf32>
      %67 = arith.addf %65, %66 : vector<8x16xf32>
      %cst_45 = arith.constant 0.000000e+00 : f32
      %68 = vector.broadcast %cst_45 : f32 to vector<8x16xf32>
      %69 = arith.cmpf oge, %67, %68 : vector<8x16xf32>
      %cst_46 = arith.constant 0.00999999977 : f32
      %70 = vector.broadcast %cst_46 : f32 to vector<8x16xf32>
      %71 = arith.mulf %70, %67 : vector<8x16xf32>
      %72 = arith.select %69, %67, %71 : vector<8x16xi1>, vector<8x16xf32>
      %73 = arith.truncf %72 : vector<8x16xf32> to vector<8x16xbf16>
      %c0_47 = arith.constant 0 : index
      %74 = arith.index_cast %arg7 : i32 to index
      %c0_48 = arith.constant 0 : index
      %c0_49 = arith.constant 0 : index
      %75 = vector.load %arg6[%c0_47, %74, %c0_48, %c0_49] : memref<1x16x8x16xbf16, #tpu.memory_space<vmem>>, vector<1x1x8x16xbf16>
      %76 = vector.shape_cast %75 : vector<1x1x8x16xbf16> to vector<8x16xbf16>
      %77 = vector.shape_cast %73 : vector<8x16xbf16> to vector<1x1x8x16xbf16>
      tpu.vector_store %arg6[%c0_47, %74, %c0_48, %c0_49], %77 {strides = array<i32>} : memref<1x16x8x16xbf16, #tpu.memory_space<vmem>>, vector<1x1x8x16xbf16>,
    }
    %c16_i32_23 = arith.constant 16 : i32
    return
  }
  func.func @transform_0(%arg0: i32, %arg1: i32) -> (i32, i32, i32, i32) {
    %c0_i32 = arith.constant 0 : i32
    %c0_i32_0 = arith.constant 0 : i32
    %c0_i32_1 = arith.constant 0 : i32
    %c0_i32_2 = arith.constant 0 : i32
    return %arg0, %c0_i32, %c0_i32_0, %c0_i32_1 : i32, i32, i32, i32
  }
  func.func @transform_1(%arg0: i32, %arg1: i32) -> (i32, i32, i32) {
    %c0_i32 = arith.constant 0 : i32
    %c0_i32_0 = arith.constant 0 : i32
    %c0_i32_1 = arith.constant 0 : i32
    %c0_i32_2 = arith.constant 0 : i32
    return %c0_i32, %c0_i32_0, %c0_i32_1 : i32, i32, i32
  }
  func.func @transform_2(%arg0: i32, %arg1: i32) -> (i32, i32) {
    %c0_i32 = arith.constant 0 : i32
    %c0_i32_0 = arith.constant 0 : i32
    %c0_i32_1 = arith.constant 0 : i32
    return %c0_i32, %c0_i32_0 : i32, i32
  }
  func.func @transform_3(%arg0: i32, %arg1: i32) -> (i32, i32) {
    %c0_i32 = arith.constant 0 : i32
    %c0_i32_0 = arith.constant 0 : i32
    %c0_i32_1 = arith.constant 0 : i32
    return %c0_i32, %c0_i32_0 : i32, i32
  }
  func.func @transform_4(%arg0: i32, %arg1: i32) -> (i32, i32, i32, i32) {
    %c0_i32 = arith.constant 0 : i32
    %c0_i32_0 = arith.constant 0 : i32
    %c0_i32_1 = arith.constant 0 : i32
    return %arg0, %arg1, %c0_i32, %c0_i32_0 : i32, i32, i32, i32
  }
}

</mosaic_0001>

<bundles_post_ra>
// kernel: basic_conv2d.1
= control target key start
LH: loop header
LB: loop body
LE: loop exit
PB: predicated region body
PF: predicated region fallthrough
CT: control target
= control target key end

     0   :  { %s1080_s15 = smov 0   ;;  %s1082_s16 = smov 0   ;;  %s1240_s0 = inlined_call_operand.vmem [shape: bf16[2,18,4,18], index: 0, kind: input, shape index: {}]   ;;  %s1241_s1 = inlined_call_operand.vmem [shape: bf16[9,8,4], index: 1, kind: input, shape index: {}]   ;;  %s1242_s2 = inlined_call_operand.vmem [shape: f32[8,1], index: 2, kind: input, shape index: {}]   ;;  %s1243_s3 = inlined_call_operand.vmem [shape: f32[8,1], index: 3, kind: input, shape index: {}]   ;;  %s1244_s4 = inlined_call_operand.vmem [shape: bf16[2,16,8,16], index: 4, kind: output, shape index: {}]  }
   0x1   :  { %s1084_s17 = smov 0  }
   0x2 LB: > { %s26_s18 = sadd.s32 1, %s1039_s16  ;;  %p845_p0 = scmp.ge.s32.totalorder %s1043_s17, 1  ;;  %s1043_s17 = sphi %s1084_s17, %s14_s17   ;;  %s1039_s16 = sphi %s1082_s16, %s1246_s16   ;;  %s1035_s15 = sphi %s1080_s15, %s1245_s15  }
   0x3   : > { %p28_p1 = scmp.ge.s32.totalorder %s26_s18, 2  ;;  %p176_p2 = scmp.lt.s32.totalorder %s1043_s17, 3 }
   0x5   : > { %s1248_s18 = smov (%p28_p1, %s26_s18), 0  ;;  %p177_p3 = pnand %p845_p0, %p176_p2 }
   0x6   : > { %p206_p4 = scmp.lt.s32.totalorder (!%p177_p3), %s1035_s15, 1  ;;  %v1101_v0 = vld [vmem:[%s1242_s2] sm:$0xff] (!%p177_p3)  ;;  %v1121_v4 = vld [vmem:[%s1241_s1 + $0x8] sm:$0xf] (!%p177_p3)  ;;  %v1126_v5 = vld [vmem:[%s1241_s1 + $0xc] sm:$0xf] (!%p177_p3) }
   0x7   : > { %180 = sbr.rel (%p177_p3) target bundleno = 418 (0x1a2), region = 36  ;;  %v1106_v1 = vld [vmem:[%s1243_s3] sm:$0xff] (!%p177_p3)  ;;  %v1131_v6 = vld [vmem:[%s1241_s1 + $0x10] sm:$0xf] (!%p177_p3)  ;;  %v1136_v7 = vld [vmem:[%s1241_s1 + $0x14] sm:$0xf] (!%p177_p3) }
   0x8   : > { %v1111_v2 = vld [vmem:[%s1241_s1] sm:$0xf] (!%p177_p3)  ;;  %v1116_v3 = vld [vmem:[%s1241_s1 + $0x4] sm:$0xf] (!%p177_p3)  ;;  %v1141_v8 = vld [vmem:[%s1241_s1 + $0x18] sm:$0xf] (!%p177_p3) }
   0x9   : > { %v1146_v9 = vld [vmem:[%s1241_s1 + $0x1c] sm:$0xf] (!%p177_p3)  ;;  %v1151_v10 = vld [vmem:[%s1241_s1 + $0x20] sm:$0xf] (!%p177_p3)  ;;  %s1163_s27 = smov (!%p177_p3), 0  }
   0xe   : > { %s1250_s15 = smov (!%p206_p4, %s1035_s15), 1 }
   0xf   : > { %s976_s19 = smul.u32 36, %s1250_s15  ;;  %s874_s20 = sshll.u32 %s1250_s15, 6 }
  0x10   : > { %s1156_s23 = scalar_lea.vmem %s1244_s4, %s874_s20 }
  0x11   : > { %s1161_s26 = scalar_lea.vmem %s1240_s0, %s976_s19 }
  0x12 LB: >> { %v256_v11 = vlaneseq  ;;  %v1049_v12 = vmov 1983009808   ;;  %v1050_v14 = vmov 0.0   ;;  %s857_s15 = sshll.u32 %s1047_s27, 1  ;;  %vm1051_vm0 = vmmov 0   ;;  %s1052_s29 = smov 127   ;;  %s1047_s27 = sphi %s1163_s27, %s247_s27  }
  0x13   : >> { %v254_v13 = vunpack.c.l.s4 %v1049_v12  ;;  %917 = vmatprep.subr.bf16.mxu0 %v1050_v14  ;;  %893 = vmatprep.subr.bf16.mxu1 %v1050_v14  ;;  %s250_s28 = scalar_lea.vmem %s1161_s26, %s857_s15  ;;  %s1053_s30 = smov 126   ;;  %v1054_v24 = vmov 0   ;;  %vm266_vm1 = vcmask 1041408   ;;  %vm262_vm2 = vcmask 31744  }
  0x14   : >> { %v257_v15 = vshrl.u32 %v256_v11, 7  ;;  %919 = vmatprep.mubr.msk.bf16.mxu0 %vm1051_vm0, %v1050_v14  ;;  %895 = vmatprep.mubr.msk.bf16.mxu1 %vm1051_vm0, %v1050_v14  ;;  %v862_v17 = vld [vmem:[%s250_s28 + $0x2] sm:$0x3]  ;;  %v251_v19 = vld [vmem:[%s250_s28] sm:$0x3]  ;;  %s871_s5 = sshll.u32 %s1047_s27, 2 }
  0x15   : >> { %v255_v16 = vunpack.c.0.s8 %v254_v13  ;;  %v867_v22 = vld [vmem:[%s250_s28 + $0x4] sm:$0x3]  ;;  %1015 = vset.pattern.permute.xlu0 %v1054_v24  ;;  %1016 = vset.pattern.permute.xlu1 %v1054_v24  ;;  %v314_v31 = vsel %vm266_vm1, %v251_v19, 0  ;;  %v413_v37 = vsel %vm266_vm1, %v862_v17, 0  ;;  %s736_s6 = scalar_lea.vmem %s1156_s23, %s871_s5  ;;  %vm737_vm4 = vcmask 125952   ;;  %s247_s27 = sadd.s32 1, %s1047_s27  }
  0x16   : >> { %v570_v32 = vsel %vm266_vm1, %v867_v22, 0  ;;  %p244_p5 = scmp.ge.s32.totalorder %s247_s27, 16  }
  0x17   : >> { %v258_v18 = vsub.s32 %v255_v16, %v257_v15 }
  0x19   : >> { %v463_v20 = vrot.slane %v862_v17, %v258_v18  ;;  %v259_v21 = vrot.slane %v251_v19, %v258_v18  ;;  %v620_v23 = vrot.slane %v867_v22, %v258_v18 }
  0x1b   : >> { %464 = vrot.lane.b32.xlu0 %v463_v20, %s1052_s29  ;;  %513 = vrot.lane.b32.xlu1 %v463_v20, %s1053_s30 }
  0x1f   : >> { %260 = vrot.lane.b32.xlu0 %v259_v21, %s1052_s29  ;;  %356 = vrot.lane.b32.xlu1 %v259_v21, %s1053_s30 }
  0x23   : >> { %621 = vrot.lane.b32.xlu0 %v620_v23, %s1052_s29  ;;  %670 = vrot.lane.b32.xlu1 %v620_v23, %s1053_s30 }
  0x27   : >> { %721 = vperm.xlu0 %1015, %v1101_v0   ;;  %727 = vperm.xlu1 %1016, %v1106_v1  }
  0x8d   : >> { %v465_v25 = vpop.permute.xlu0 %464  ;;  %v514_v26 = vpop.permute.xlu1 %513 }
  0x8e   : >> { %v470_v27 = vsel %vm266_vm1, %v465_v25, 0  ;;  %v519_v28 = vsel %vm266_vm1, %v514_v26, 0 }
  0x8f   : >> { %918 = vmatpush3.bf16.msra.mxu0 %v470_v27 }
  0x90   : >> { %923 = vmatprep.subr.bf16.mxu0 %v1050_v14 }
  0x91   : >> { %v261_v29 = vpop.permute.xlu0 %260  ;;  %v357_v33 = vpop.permute.xlu1 %356 }
  0x92   : >> { %920 = vmatmul.mubr.msk.bf16.vlgmr.msra.gmra.mrb[0].mxu0 %vm262_vm2, %v1131_v6  ;;  %v268_v30 = vsel %vm266_vm1, %v261_v29, 0  ;;  %v362_v34 = vsel %vm266_vm1, %v357_v33, 0 }
  0x93   : >> { %894 = vmatpush3.bf16.msra.mxu1 %v268_v30  ;;  %924 = vmatpush3.bf16.msra.mxu0 %v519_v28 }
  0x94   : >> { %925 = vmatprep.mubr.msk.bf16.mxu0 %vm1051_vm0, %v1050_v14  ;;  %899 = vmatprep.subr.bf16.mxu1 %v1050_v14 }
  0x95   : >> { %929 = vmatprep.subr.bf16.mxu0 %v1050_v14  ;;  %v622_v35 = vpop.permute.xlu0 %621  ;;  %v671_v38 = vpop.permute.xlu1 %670 }
  0x96   : >> { %896 = vmatmul.mubr.msk.bf16.vlgmr.msra.gmra.mrb[0].mxu1 %vm262_vm2, %v1116_v3  ;;  %v627_v36 = vsel %vm266_vm1, %v622_v35, 0  ;;  %v676_v39 = vsel %vm266_vm1, %v671_v38, 0 }
  0x97   : >> { %900 = vmatpush3.bf16.msra.mxu1 %v314_v31  ;;  %901 = vmatprep.mubr.msk.bf16.mxu1 %vm1051_vm0, %v1050_v14 }
  0x98   : >> { %905 = vmatprep.subr.bf16.mxu1 %v1050_v14 }
  0x9e   : >> { %926 = vmatmul.mubr.msk.bf16.vlgmr.msra.gmra.mrb[0].mxu0 %vm262_vm2, %v1136_v7 }
  0x9f   : >> { %930 = vmatpush3.bf16.msra.mxu0 %v570_v32  ;;  %931 = vmatprep.mubr.msk.bf16.mxu0 %vm1051_vm0, %v1050_v14 }
  0xa0   : >> { %935 = vmatprep.subr.bf16.mxu0 %v1050_v14 }
  0xa2   : >> { %902 = vmatmul.mubr.msk.bf16.vlgmr.msra.gmra.mrb[0].mxu1 %vm262_vm2, %v1111_v2 }
  0xa3   : >> { %906 = vmatpush3.bf16.msra.mxu1 %v362_v34  ;;  %907 = vmatprep.mubr.msk.bf16.mxu1 %vm1051_vm0, %v1050_v14 }
  0xa4   : >> { %911 = vmatprep.subr.bf16.mxu1 %v1050_v14 }
  0xa6   : >> { %v722_v45 = vpop.permute.xlu0 %721  ;;  %v728_v49 = vpop.permute.xlu1 %727 }
  0xaa   : >> { %932 = vmatmul.mubr.msk.bf16.vlgmr.msra.gmra.mrb[0].mxu0 %vm262_vm2, %v1141_v8 }
  0xab   : >> { %936 = vmatpush3.bf16.msra.mxu0 %v627_v36  ;;  %937 = vmatprep.mubr.msk.bf16.mxu0 %vm1051_vm0, %v1050_v14 }
  0xac   : >> { %941 = vmatprep.subr.bf16.mxu0 %v1050_v14 }
  0xae   : >> { %908 = vmatmul.mubr.msk.bf16.vlgmr.msra.gmra.mrb[0].mxu1 %vm262_vm2, %v1121_v4 }
  0xaf   : >> { %912 = vmatpush3.bf16.msra.mxu1 %v413_v37  ;;  %913 = vmatprep.mubr.msk.bf16.mxu1 %vm1051_vm0, %v1050_v14 }
  0xb6   : >> { %938 = vmatmul.mubr.msk.bf16.vlgmr.msra.gmra.mrb[0].mxu0 %vm262_vm2, %v1146_v9 }
  0xb7   : >> { %942 = vmatpush3.bf16.msra.mxu0 %v676_v39  ;;  %943 = vmatprep.mubr.msk.bf16.mxu0 %vm1051_vm0, %v1050_v14 }
  0xba   : >> { %914 = vmatmul.mubr.msk.bf16.vlgmr.msra.gmra.mrb[0].mxu1 %vm262_vm2, %v1126_v5 }
  0xc2   : >> { %944 = vmatmul.mubr.msk.bf16.vlgmr.msra.gmra.mrb[0].mxu0 %vm262_vm2, %v1151_v10 }
 0x18d   : >> { %v449_v40 = vpop.f32.mrb[0].mxu1 }
 0x18e   : >> { %v915_v41 = vpop.f32.mrb[1].mxu1 }
 0x18f   : >> { %v452_v42 = vpop.f32.mrb[2].mxu1 }
 0x190   : >> { %v916_v43 = vpop.f32.mrb[3].mxu1 }
 0x195   : >> { %v712_v44 = vpop.f32.mrb[0].mxu0 }
 0x196   : >> { %v947_v46 = vadd.f32 %v712_v44, %v449_v40  ;;  %v945_v47 = vpop.f32.mrb[1].mxu0 }
 0x197   : >> { %v715_v48 = vpop.f32.mrb[2].mxu0 }
 0x198   : >> { %v724_v50 = vmul.f32 %v947_v46, %v722_v45  ;;  %v946_v51 = vpop.f32.mrb[3].mxu0 }
 0x19a   : >> { %v730_v52 = vadd.f32 %v728_v49, %v724_v50 }
 0x19b   : > { %246 = sbr.rel (!%p244_p5) target bundleno = 18 (0x12), region = 85 }
 0x19c   : >> { %vm731_vm3 = vcmp.ge.f32.partialorder %v730_v52, 0.0  ;;  %v732_v53 = vmul.f32 0.01, %v730_v52 }
 0x19e   : >> { %v733_v54 = vsel %vm731_vm3, %v730_v52, %v732_v53 }
 0x19f   : >> { %v734_v55 = vpack.c.bf16 %v733_v54, %v733_v54 }
 0x1a1   : >> { %738 = vst.msk [vmem:[%s736_s6] sm:$0xf] %vm737_vm4, %v734_v55 }
 0x1a2 PF: > { %s14_s17 = sadd.s32 1, %s1043_s17   ;;  %s1245_s15 = smov %s1039_s16 }
 0x1a3   : > { %p11_p6 = scmp.ge.s32.totalorder %s14_s17, 4   ;;  %s1246_s16 = smov %s1248_s18 }
 0x1a5   :  { %13 = sbr.rel (!%p11_p6) target bundleno = 2 (0x2), region = 96 }

</bundles_post_ra>
